<compile_context>
chip_gen: v6e
topology: v6e:2x2x1
jax: 0.10.0
libtpu: 0.0.40
codegen_flags: <defaults>
</compile_context>

<pallas_src>
import jax
import jax.numpy as jnp
from jax.experimental import pallas as pl
from jax.experimental.pallas import tpu as pltpu  # noqa: F401  (TPU backend)

# ----------------------------- problem sizes -------------------------------
N, C_IN, H, W = 2, 4, 16, 16          # input  (NCHW, like the torch module)
HW = H * W                            # 256 pixels per image -> lane axis
LATENT = 8                            # latent_channel_list = [8]
C_ENC_OUT = 2 * LATENT                # encoder emits mu || log_var

# packed-parameter block geometry (all four param tensors in one DMA)
ENC_ROWS = N * C_ENC_OUT              # 32  block-diag encoder weight rows
DEC_ROWS = N * C_IN                   # 8   block-diag decoder weight rows
ENC_K = N * C_IN                      # 8   encoder contraction dim
DEC_K = N * LATENT                    # 16  decoder contraction dim
P_ROWS = ENC_ROWS + DEC_ROWS          # 40
P_COLS = max(ENC_K + 1, DEC_K + 1)    # 17  (weight cols + 1 bias col, padded)


# ------------------------------- kernel ------------------------------------
def vae_kernel(x_ref, eps_ref, p_ref, recon_ref, h_ref):
    # x_ref:   (N*C_IN,   HW) = (8, 256)   channels on sublanes, pixels on lanes
    # eps_ref: (N*LATENT, HW) = (16, 256)
    # p_ref:   (P_ROWS, P_COLS) packed [w_enc_bd|b_enc ; w_dec_bd|b_dec]
    x = x_ref[...]
    eps = eps_ref[...]
    p = p_ref[...]

    w_enc = p[:ENC_ROWS, :ENC_K]                 # (32, 8)  block-diag over batch
    b_enc = p[:ENC_ROWS, ENC_K:ENC_K + 1]        # (32, 1)
    w_dec = p[ENC_ROWS:, :DEC_K]                 # (8, 16)  block-diag over batch
    b_dec = p[ENC_ROWS:, DEC_K:DEC_K + 1]        # (8, 1)

    # encoder (pointwise conv): one MXU dot covers both images.
    # h rows [n*16 : n*16+8] = mu_n, [n*16+8 : (n+1)*16] = log_var_n.
    h = jnp.dot(w_enc, x, preferred_element_type=jnp.float32) + b_enc   # (32, 256)

    # chunk(2, dim=channel) per image, gathered to match eps row layout
    # (eps rows [n*LATENT : (n+1)*LATENT] belong to image n).
    mu = jnp.concatenate(
        [h[n * C_ENC_OUT:n * C_ENC_OUT + LATENT] for n in range(N)], axis=0)
    log_var = jnp.concatenate(
        [h[n * C_ENC_OUT + LATENT:(n + 1) * C_ENC_OUT] for n in range(N)], axis=0)

    # reparameterization: z = eps * exp(0.5 * log_var) + mu   (EUP exp + VPU fma)
    z = eps * jnp.exp(0.5 * log_var) + mu                                # (16, 256)

    # decoder (pointwise conv): one MXU dot covers both images.
    recon = jnp.dot(w_dec, z, preferred_element_type=jnp.float32) + b_dec  # (8, 256)

    # lane-dense stores (last dim = 256), only 2 output DMAs
    recon_ref[...] = recon.astype(recon_ref.dtype)
    h_ref[...] = h.astype(h_ref.dtype)


# ------------------------------- wrapper ------------------------------------
def _block_diag(w, n):
    """Batch-block-diagonalize a tiny (o, c) weight -> (n*o, n*c)."""
    o, c = w.shape
    out = jnp.zeros((n * o, n * c), dtype=w.dtype)
    for i in range(n):
        out = out.at[i * o:(i + 1) * o, i * c:(i + 1) * c].set(w)
    return out


@jax.jit
def vae_forward(x_nchw, eps, w_enc, b_enc, w_dec, b_dec):
    # NCHW -> (N*C, H*W): contiguous reshapes only (no transposes), full 8-sublane tiles.
    x_flat = x_nchw.reshape(N * C_IN, HW)
    eps_flat = eps.reshape(N * LATENT, HW)

    # Pack all four parameter tensors into ONE padded block (single input DMA).
    w_enc_bd = _block_diag(w_enc, N)                       # (32, 8)
    w_dec_bd = _block_diag(w_dec, N)                       # (8, 16)
    enc_blk = jnp.concatenate([w_enc_bd, jnp.tile(b_enc, (N, 1))], axis=1)  # (32, 9)
    dec_blk = jnp.concatenate([w_dec_bd, jnp.tile(b_dec, (N, 1))], axis=1)  # (8, 17)
    enc_blk = jnp.pad(enc_blk, ((0, 0), (0, P_COLS - enc_blk.shape[1])))
    params = jnp.concatenate([enc_blk, dec_blk], axis=0)   # (40, 17)

    flops = 2 * N * HW * (C_ENC_OUT * C_IN + C_IN * LATENT)
    transcendentals = N * LATENT * HW
    bytes_accessed = 4 * (x_flat.size + eps_flat.size + params.size
                          + N * C_IN * HW + N * C_ENC_OUT * HW)

    recon_flat, h_flat = pl.pallas_call(
        vae_kernel,
        out_shape=(
            jax.ShapeDtypeStruct((N * C_IN, HW), jnp.float32),      # reconstruction
            jax.ShapeDtypeStruct((N * C_ENC_OUT, HW), jnp.float32),  # mu || log_var slab
        ),
        cost_estimate=pl.CostEstimate(
            flops=flops,
            transcendentals=transcendentals,
            bytes_accessed=bytes_accessed),
    )(x_flat, eps_flat, params)

    # Split encoder slab into mu / log_var outside the kernel; free reshapes to NCHW.
    h3 = h_flat.reshape(N, C_ENC_OUT, HW)
    recon = recon_flat.reshape(N, C_IN, H, W)
    mu = h3[:, :LATENT, :].reshape(N, LATENT, H, W)
    log_var = h3[:, LATENT:, :].reshape(N, LATENT, H, W)
    return recon, mu, log_var


# --------------------------------- main --------------------------------------
if __name__ == "__main__":
    root = jax.random.PRNGKey(0)
    kx, keps, kwe, kbe, kwd, kbd = jax.random.split(root, 6)

    # deterministic example input (NCHW, as the torch module expects)
    x = jax.random.normal(kx, (N, C_IN, H, W), dtype=jnp.float32)

    # eps ~ N(0, 1) like torch.randn_like(std) (drawn outside the kernel)
    eps = jax.random.normal(keps, (N, LATENT, H, W), dtype=jnp.float32)

    # deterministic synthetic parameters (shapes implied by the forward pass)
    w_enc = jax.random.normal(kwe, (C_ENC_OUT, C_IN), dtype=jnp.float32) * 0.1
    b_enc = jax.random.normal(kbe, (C_ENC_OUT, 1), dtype=jnp.float32) * 0.01
    w_dec = jax.random.normal(kwd, (C_IN, LATENT), dtype=jnp.float32) * 0.1
    b_dec = jax.random.normal(kbd, (C_IN, 1), dtype=jnp.float32) * 0.01

    recon, mu, log_var = vae_forward(x, eps, w_enc, b_enc, w_dec, b_dec)
    jax.block_until_ready((recon, mu, log_var))

    # plain-JAX reference of the same forward pass
    h_ref = jnp.einsum('oc,nchw->nohw', w_enc, x) + b_enc.reshape(1, C_ENC_OUT, 1, 1)
    mu_ref, lv_ref = h_ref[:, :LATENT], h_ref[:, LATENT:]
    z_ref = eps * jnp.exp(0.5 * lv_ref) + mu_ref
    rec_ref = jnp.einsum('cl,nlhw->nchw', w_dec, z_ref) + b_dec.reshape(1, C_IN, 1, 1)

    assert recon.shape == (N, C_IN, H, W)
    assert mu.shape == (N, LATENT, H, W)
    assert log_var.shape == (N, LATENT, H, W)
    assert jnp.allclose(mu, mu_ref, atol=1e-5, rtol=1e-5)
    assert jnp.allclose(log_var, lv_ref, atol=1e-5, rtol=1e-5)
    assert jnp.allclose(recon, rec_ref, atol=1e-5, rtol=1e-5)
    assert jnp.all(jnp.isfinite(recon))

    print("KERNEL_OK")
</pallas_src>

<mosaic_0001>
module attributes {stable_mosaic.version = 11 : i64} {
  func.func @vae_kernel(%arg0: memref<8x256xf32, #tpu.memory_space<vmem>>, %arg1: memref<16x256xf32, #tpu.memory_space<vmem>>, %arg2: memref<40x17xf32, #tpu.memory_space<vmem>>, %arg3: memref<8x256xf32, #tpu.memory_space<vmem>>, %arg4: memref<32x256xf32, #tpu.memory_space<vmem>>) attributes {dimension_semantics = [], scalar_prefetch = 0 : i64, scratch_operands = 0 : i64, tpu.core_type = #tpu.core_type<tc>} {
    %c0 = arith.constant 0 : index
    %c0_0 = arith.constant 0 : index
    %0 = vector.load %arg0[%c0, %c0_0] : memref<8x256xf32, #tpu.memory_space<vmem>>, vector<8x256xf32>
    %c0_1 = arith.constant 0 : index
    %c0_2 = arith.constant 0 : index
    %1 = vector.load %arg1[%c0_1, %c0_2] : memref<16x256xf32, #tpu.memory_space<vmem>>, vector<16x256xf32>
    %c0_3 = arith.constant 0 : index
    %c0_4 = arith.constant 0 : index
    %2 = vector.load %arg2[%c0_3, %c0_4] : memref<40x17xf32, #tpu.memory_space<vmem>>, vector<40x17xf32>
    %3 = vector.extract_strided_slice %2 {offsets = [0, 0], sizes = [32, 8], strides = [1, 1]} : vector<40x17xf32> to vector<32x8xf32>
    %4 = vector.extract_strided_slice %2 {offsets = [0, 8], sizes = [32, 1], strides = [1, 1]} : vector<40x17xf32> to vector<32x1xf32>
    %5 = vector.extract_strided_slice %2 {offsets = [32, 0], sizes = [8, 16], strides = [1, 1]} : vector<40x17xf32> to vector<8x16xf32>
    %6 = vector.extract_strided_slice %2 {offsets = [32, 16], sizes = [8, 1], strides = [1, 1]} : vector<40x17xf32> to vector<8x1xf32>
    %cst = arith.constant dense<0.000000e+00> : vector<32x256xf32>
    %7 = tpu.matmul %3, %0, %cst {dimension_numbers = #tpu.dot_dimension_numbers<[1], [0], [0], [1], [0, 0, 1, 1], [], []>} : vector<32x8xf32>, vector<8x256xf32>, vector<32x256xf32> -> vector<32x256xf32>
    %8 = vector.broadcast %4 : vector<32x1xf32> to vector<32x256xf32>
    %9 = arith.addf %7, %8 : vector<32x256xf32>
    %10 = vector.extract_strided_slice %9 {offsets = [0, 0], sizes = [8, 256], strides = [1, 1]} : vector<32x256xf32> to vector<8x256xf32>
    %11 = vector.extract_strided_slice %9 {offsets = [16, 0], sizes = [8, 256], strides = [1, 1]} : vector<32x256xf32> to vector<8x256xf32>
    %12 = tpu.concatenate %10, %11 in 0 : vector<8x256xf32>, vector<8x256xf32> -> vector<16x256xf32>
    %13 = vector.extract_strided_slice %9 {offsets = [8, 0], sizes = [8, 256], strides = [1, 1]} : vector<32x256xf32> to vector<8x256xf32>
    %14 = vector.extract_strided_slice %9 {offsets = [24, 0], sizes = [8, 256], strides = [1, 1]} : vector<32x256xf32> to vector<8x256xf32>
    %15 = tpu.concatenate %13, %14 in 0 : vector<8x256xf32>, vector<8x256xf32> -> vector<16x256xf32>
    %cst_5 = arith.constant 5.000000e-01 : f32
    %16 = vector.broadcast %cst_5 : f32 to vector<16x256xf32>
    %17 = arith.mulf %16, %15 : vector<16x256xf32>
    %18 = math.exp %17 : vector<16x256xf32>
    %19 = arith.mulf %1, %18 : vector<16x256xf32>
    %20 = arith.addf %19, %12 : vector<16x256xf32>
    %cst_6 = arith.constant dense<0.000000e+00> : vector<8x256xf32>
    %21 = tpu.matmul %5, %20, %cst_6 {dimension_numbers = #tpu.dot_dimension_numbers<[1], [0], [0], [1], [0, 0, 1, 1], [], []>} : vector<8x16xf32>, vector<16x256xf32>, vector<8x256xf32> -> vector<8x256xf32>
    %22 = vector.broadcast %6 : vector<8x1xf32> to vector<8x256xf32>
    %23 = arith.addf %21, %22 : vector<8x256xf32>
    %c0_7 = arith.constant 0 : index
    %c0_8 = arith.constant 0 : index
    %24 = vector.load %arg3[%c0_7, %c0_8] : memref<8x256xf32, #tpu.memory_space<vmem>>, vector<8x256xf32>
    tpu.vector_store %arg3[%c0_7, %c0_8], %23 {strides = array<i32>} : memref<8x256xf32, #tpu.memory_space<vmem>>, vector<8x256xf32>,
    %c0_9 = arith.constant 0 : index
    %c0_10 = arith.constant 0 : index
    %25 = vector.load %arg4[%c0_9, %c0_10] : memref<32x256xf32, #tpu.memory_space<vmem>>, vector<32x256xf32>
    tpu.vector_store %arg4[%c0_9, %c0_10], %9 {strides = array<i32>} : memref<32x256xf32, #tpu.memory_space<vmem>>, vector<32x256xf32>,
    return
  }
}

</mosaic_0001>

<bundles_post_ra>
// kernel: vae_forward.1
= control target key start
LH: loop header
LB: loop body
LE: loop exit
PB: predicated region body
PF: predicated region fallthrough
CT: control target
= control target key end

     0   :  { %v283_v2 = vmov 0.0   ;;  %vm47_vm0 = vcmask 64512   ;;  %v284_v7 = vmov 8   ;;  %v285_v9 = vmov 16   ;;  %s382_s0 = inlined_call_operand.vmem [shape: f32[8,256], index: 0, kind: input, shape index: {}]   ;;  %s383_s2 = inlined_call_operand.vmem [shape: f32[40,17], index: 2, kind: input, shape index: {}]   ;;  %s384_s4 = inlined_call_operand.vmem [shape: f32[32,256], index: 4, kind: output, shape index: {1}]   ;;  %s385_s1 = inlined_call_operand.vmem [shape: f32[16,256], index: 1, kind: input, shape index: {}]   ;;  %s386_s3 = inlined_call_operand.vmem [shape: f32[8,256], index: 3, kind: output, shape index: {0}]  }
   0x1   :  { %v17_v0 = vld [vmem:[%s382_s0 + $0x8] sm:$0xff]  ;;  %v16_v1 = vld [vmem:[%s382_s0] sm:$0xff]  ;;  %120 = vmatprep.mubr.f32.mxu0 %v283_v2  ;;  %138 = vmatprep.mubr.f32.mxu1 %v283_v2  ;;  %v25_v4 = vld [vmem:[%s383_s2 + $0x18] sm:$0xff]  ;;  %vm170_vm1 = vcmask 130048  }
   0x2   :  { %v22_v3 = vld [vmem:[%s383_s2] sm:$0xff]  ;;  %86 = vmatprep.subr.mxu0 %v17_v0  ;;  %267 = vmatprep.subr.mxu1 %v17_v0  ;;  %v23_v5 = vld [vmem:[%s383_s2 + $0x8] sm:$0xff]  ;;  %v24_v6 = vld [vmem:[%s383_s2 + $0x10] sm:$0xff] }
   0x3   :  { %87 = vmatpush1.msra.mxu0 %v16_v1  ;;  %268 = vmatpush1.msra.mxu1 %v16_v1  ;;  %v336_v8 = vld [vmem:[%s383_s2 + $0x20] sm:$0xff]  ;;  %v20_v38 = vld [vmem:[%s385_s1 + $0x10] sm:$0xff]  ;;  %v21_v40 = vld [vmem:[%s385_s1 + $0x18] sm:$0xff] }
   0x4   :  { %262 = vmatmul.mubr.msk.f32.vlgmr.msra.gmra.mxu0 %vm47_vm0, %v22_v3  ;;  %265 = vmatmul.mubr.msk.f32.vlgmr.msra.gmra.mxu1 %vm47_vm0, %v25_v4  ;;  %v18_v44 = vld [vmem:[%s385_s1] sm:$0xff]  ;;  %v19_v47 = vld [vmem:[%s385_s1 + $0x8] sm:$0xff] }
   0x5   :  { %126 = vmatprep.mubr.f32.mxu0 %v283_v2  ;;  %273 = vset.pattern.permute.xlu1 %v284_v7 }
   0x6   :  { %39 = vperm.xlu1 %273, %v24_v6   ;;  %272 = vset.pattern.permute.xlu0 %v284_v7 }
   0x7   :  { %44 = vperm.xlu0 %272, %v25_v4   ;;  %237 = vmatprep.mubr.f32.mxu1 %v283_v2 }
   0x8   :  { %263 = vmatmul.mubr.msk.f32.gmra.mxu0 %vm47_vm0, %v23_v5 }
   0x9   :  { %132 = vmatprep.mubr.f32.mxu0 %v283_v2 }
   0xa   :  { %29 = vperm.xlu1 %273, %v22_v3  }
   0xb   :  { %34 = vperm.xlu0 %272, %v23_v5  }
   0xc   :  { %264 = vmatmul.mubr.msk.f32.gmra.mxu0 %vm47_vm0, %v24_v6 }
   0xf   :  { %274 = vset.pattern.permute.xlu0 %v285_v9 }
  0x10   :  { %167 = vperm.xlu0 %274, %v336_v8  }
  0x81   :  { %v40_v10 = vpop.permute.xlu1 %39 }
  0x82   :  { %v45_v11 = vpop.permute.xlu0 %44 }
  0x85   :  { %v30_v12 = vpop.permute.xlu1 %29 }
  0x86   :  { %v35_v22 = vpop.permute.xlu0 %34 }
  0x8b   :  { %v168_v54 = vpop.permute.xlu0 %167 }
  0xc4   :  { %v122_v13 = vpop.f32.mrf.mxu0  ;;  %v140_v14 = vpop.f32.mrf.mxu1 }
  0xc5   :  { %v123_v15 = vadd.f32 %v122_v13, %v30_v12  ;;  %v141_v16 = vadd.f32 %v140_v14, %v45_v11 }
  0xc6   :  { %v124_v17 = vpop.f32.mrf.mxu0  ;;  %v142_v18 = vpop.f32.mrf.mxu1 }
  0xc7   :  { %246 = vst [vmem:[%s384_s4] sm:$0xff] %v123_v15  ;;  %v147_v19 = vmul.f32 0.5, %v141_v16  ;;  %252 = vst [vmem:[%s384_s4 + $0x30] sm:$0xff] %v141_v16  ;;  %v125_v20 = vadd.f32 %v124_v17, %v30_v12  ;;  %v143_v21 = vadd.f32 %v142_v18, %v45_v11 }
  0xc8   :  { %v128_v23 = vpop.f32.mrf.mxu0 }
  0xc9   :  { %v153_v24 = vmul.f32 1.442695, %v147_v19  ;;  %247 = vst [vmem:[%s384_s4 + $0x8] sm:$0xff] %v125_v20  ;;  %v148_v25 = vmul.f32 0.5, %v143_v21  ;;  %253 = vst [vmem:[%s384_s4 + $0x38] sm:$0xff] %v143_v21  ;;  %v129_v26 = vadd.f32 %v128_v23, %v35_v22 }
  0xca   :  { %v130_v27 = vpop.f32.mrf.mxu0 }
  0xcb   :  { %275 = vpow2.f32 %v153_v24  ;;  %v155_v28 = vmul.f32 1.442695, %v148_v25  ;;  %v145_v29 = vmul.f32 0.5, %v129_v26  ;;  %248 = vst [vmem:[%s384_s4 + $0x10] sm:$0xff] %v129_v26  ;;  %v131_v30 = vadd.f32 %v130_v27, %v35_v22 }
  0xcc   :  { %v134_v31 = vpop.f32.mrf.mxu0 }
  0xcd   :  { %277 = vpow2.f32 %v155_v28  ;;  %v149_v32 = vmul.f32 1.442695, %v145_v29  ;;  %v146_v33 = vmul.f32 0.5, %v131_v30  ;;  %249 = vst [vmem:[%s384_s4 + $0x18] sm:$0xff] %v131_v30  ;;  %v135_v34 = vadd.f32 %v134_v31, %v40_v10 }
  0xce   :  { %v136_v35 = vpop.f32.mrf.mxu0 }
  0xcf   :  { %279 = vpow2.f32 %v149_v32  ;;  %v151_v36 = vmul.f32 1.442695, %v146_v33  ;;  %250 = vst [vmem:[%s384_s4 + $0x20] sm:$0xff] %v135_v34  ;;  %v137_v37 = vadd.f32 %v136_v35, %v40_v10 }
  0xd1   :  { %281 = vpow2.f32 %v151_v36  ;;  %251 = vst [vmem:[%s384_s4 + $0x28] sm:$0xff] %v137_v37 }
  0xd8   :  { %v276_v39 = vpop.eup %275 }
  0xd9   :  { %v159_v41 = vmul.f32 %v276_v39, %v20_v38 }
  0xda   :  { %v278_v42 = vpop.eup %277 }
  0xdb   :  { %v160_v43 = vmul.f32 %v278_v42, %v21_v40  ;;  %v163_v46 = vadd.f32 %v159_v41, %v135_v34 }
  0xdc   :  { %v280_v45 = vpop.eup %279 }
  0xdd   :  { %v164_v48 = vadd.f32 %v160_v43, %v137_v37  ;;  %v157_v50 = vmul.f32 %v280_v45, %v18_v44 }
  0xde   :  { %v282_v49 = vpop.eup %281 }
  0xdf   :  { %201 = vmatprep.subr.mxu1 %v164_v48  ;;  %v158_v51 = vmul.f32 %v282_v49, %v19_v47  ;;  %v161_v53 = vadd.f32 %v157_v50, %v123_v15 }
  0xe0   :  { %202 = vmatpush1.msra.mxu1 %v163_v46 }
  0xe1   :  { %v162_v52 = vadd.f32 %v158_v51, %v125_v20 }
  0xe3   :  { %203 = vmatprep.subr.mxu1 %v162_v52 }
  0xe4   :  { %204 = vmatpush1.msra.mxu1 %v161_v53 }
  0xe5   :  { %266 = vmatmul.mubr.msk.f32.vlgmr.msra.gmra.mxu1 %vm170_vm1, %v336_v8 }
 0x1a5   :  { %v239_v55 = vpop.f32.mrf.mxu1 }
 0x1a6   :  { %v240_v56 = vadd.f32 %v239_v55, %v168_v54 }
 0x1a7   :  { %v241_v57 = vpop.f32.mrf.mxu1 }
 0x1a8   :  { %244 = vst [vmem:[%s386_s3] sm:$0xff] %v240_v56  ;;  %v242_v58 = vadd.f32 %v241_v57, %v168_v54 }
 0x1aa   :  { %245 = vst [vmem:[%s386_s3 + $0x8] sm:$0xff] %v242_v58 }

</bundles_post_ra>
